<compile_context>
chip_gen: v7x
topology: tpu7x:2x2x1
jax: 0.10.0
libtpu: 0.0.40
codegen_flags: <defaults>
</compile_context>

<pallas_src>
import math
import functools

import jax
import jax.numpy as jnp
from jax.experimental import pallas as pl
from jax.experimental.pallas import tpu as pltpu


def _make_pe_table(seq_len, d_model, dtype=jnp.float32):
    """Sinusoidal PE table, identical to the PyTorch buffer construction."""
    pos = jnp.arange(seq_len, dtype=jnp.float32)[:, None]
    div_term = jnp.exp(
        jnp.arange(0, d_model, 2, dtype=jnp.float32) * (-math.log(10000.0) / d_model)
    )
    pe = jnp.zeros((seq_len, d_model), dtype=jnp.float32)
    pe = pe.at[:, 0::2].set(jnp.sin(pos * div_term))
    pe = pe.at[:, 1::2].set(jnp.cos(pos * div_term)[:, : d_model // 2])
    return pe.astype(dtype)


def _hash_u32(x, seed):
    """lowbias32 integer hash -> uniform uint32 bits (plain VPU int ops)."""
    x = x ^ jnp.uint32(seed & 0xFFFFFFFF)
    x = (x ^ (x >> 16)) * jnp.uint32(0x7FEB352D)
    x = (x ^ (x >> 15)) * jnp.uint32(0x846CA68B)
    x = x ^ (x >> 16)
    return x


def _pe_dropout_kernel(x_ref, pe_ref, o_ref, *, p, training, seed, block_rows, lane):
    # Blocks: (block_rows, lane).  Pure load-add-store plus (optionally) a
    # handful of integer VPU ops for the dropout mask.
    y = x_ref[...] + pe_ref[...]

    if training and p >= 1.0:
        y = jnp.zeros_like(y)
    elif training and p > 0.0:
        # Inverted dropout.  Mask = hash(global element index, seed); it is
        # independent of the tile/grid choice.  (RNG stream differs from torch
        # by design -- documented, not bit-compatible.)
        row0 = pl.program_id(0) * block_rows
        rows = jax.lax.broadcasted_iota(jnp.int32, y.shape, 0) + row0
        cols = jax.lax.broadcasted_iota(jnp.int32, y.shape, 1)
        idx = (rows * lane + cols).astype(jnp.uint32)
        bits31 = (_hash_u32(idx, seed) >> 1).astype(jnp.int32)  # uniform in [0, 2^31)
        thr31 = jnp.int32(min(int(p * float(1 << 31)), (1 << 31) - 1))
        scale = jnp.asarray(1.0 / (1.0 - p), dtype=y.dtype)
        y = jnp.where(bits31 >= thr31, y * scale, jnp.zeros_like(y))
    # else: eval mode / p == 0 -> dropout is identity.

    o_ref[...] = y


def _plan_tiles(B, S, D, itemsize, target_bytes):
    """Lane-dense folding + row tiling.  Returns (C, R, TR, k, nrt):
       C=128 lanes, R rows per (padded) batch, TR rows per tile,
       k = whole batches per tile (or None), nrt = row-tiles per batch."""
    C = 128
    sub = {4: 8, 2: 16, 1: 32}.get(itemsize, 8)  # dtype-aware sublane multiple
    L = S * D
    budget_rows = max(sub, ((target_bytes // (C * itemsize)) // sub) * sub)

    # Mode A: whole tensor (padded only to lane width) fits in one block.
    R0 = -(-L // C)
    if B * R0 <= budget_rows:
        return C, R0, B * R0, B, 1

    # Streaming: pad per-batch rows to the sublane multiple so tiles align.
    R = -(-L // (C * sub)) * sub

    # Mode B: each tile covers k whole batches -> PE slab stays resident.
    if R <= budget_rows:
        k = 1
        for cand in range(min(B, budget_rows // R), 0, -1):
            if B % cand == 0:
                k = cand
                break
        return C, R, k * R, k, 1

    # Mode C: tile inside a batch; TR divides R, PE index_map is batch-periodic.
    TR = sub
    t = (budget_rows // sub) * sub
    while t >= sub:
        if R % t == 0:
            TR = t
            break
        t -= sub
    return C, R, TR, None, R // TR


def positional_encoding(x, *, d_model, dropout_p=0.1, training=False, seed=0,
                        target_bytes=4 << 20):
    """x: (B, S, D) array.  Returns dropout(x + PE[:S]) (PyTorch forward)."""
    B, S, D = x.shape
    assert D == d_model
    dtype = x.dtype
    itemsize = dtype.itemsize

    # PE computed once in the wrapper (matches the registered buffer).
    pe = _make_pe_table(S, D, dtype=dtype)  # (S, D)

    C, R, TR, k, nrt = _plan_tiles(B, S, D, itemsize, target_bytes)
    L = S * D
    Lp = R * C  # padded per-batch flat length

    # Lane-dense fold: (B, S, D) -> (B*R, 128), zero-padded per batch.
    x_flat = x.reshape(B, L)
    pe_flat = pe.reshape(1, L)
    if Lp > L:
        x_flat = jnp.pad(x_flat, ((0, 0), (0, Lp - L)))
        pe_flat = jnp.pad(pe_flat, ((0, 0), (0, Lp - L)))
    x_f = x_flat.reshape(B * R, C)
    pe_rows = pe_flat.reshape(R, C)
    # PE array has nrt*TR rows: (TR, C) when a tile spans whole batches
    # (constant index_map -> DMA'd once, resident), (R, C) otherwise.
    pe_arr = jnp.tile(pe_rows, (k, 1)) if (k is not None and k > 1) else pe_rows

    grid = ((B * R) // TR,)
    if nrt == 1:
        pe_index_map = lambda i: (0, 0)       # resident across all grid steps
    else:
        pe_index_map = lambda i: (i % nrt, 0)  # batch-periodic

    kernel = functools.partial(
        _pe_dropout_kernel,
        p=float(dropout_p),
        training=bool(training),
        seed=int(seed),
        block_rows=int(TR),
        lane=int(C),
    )

    tile_bytes = TR * C * itemsize
    vmem_limit = int(min(56 << 20, max(6 * tile_bytes + (2 << 20), 16 << 20)))

    out = pl.pallas_call(
        kernel,
        out_shape=jax.ShapeDtypeStruct((B * R, C), dtype),
        grid=grid,
        in_specs=[
            pl.BlockSpec((TR, C), lambda i: (i, 0)),  # x tile
            pl.BlockSpec((TR, C), pe_index_map),      # PE tile
        ],
        out_specs=pl.BlockSpec((TR, C), lambda i: (i, 0)),
        input_output_aliases={0: 0},  # in place: x block -> out block
        compiler_params=pltpu.CompilerParams(
            dimension_semantics=("parallel",),
            vmem_limit_bytes=vmem_limit,
        ),
    )(x_f, pe_arr)

    return out.reshape(B, Lp)[:, :L].reshape(B, S, D)


if __name__ == "__main__":
    # Module config: d_model=32, seq_len=8, dropout=0.1; batch=2.
    d_model, seq_len, dropout_p = 32, 8, 0.1
    batch = 2

    key = jax.random.PRNGKey(0)
    x = jax.random.normal(key, (batch, seq_len, d_model), dtype=jnp.float32)
    ref = x + _make_pe_table(seq_len, d_model)[None]

    # Eval mode (dropout = identity) -> deterministic, checkable.
    out = jax.block_until_ready(
        positional_encoding(x, d_model=d_model, dropout_p=dropout_p, training=False)
    )
    assert out.shape == (batch, seq_len, d_model)
    assert jnp.allclose(out, ref, atol=1e-5, rtol=1e-5), "mismatch vs reference (eval)"

    # Training / dropout path (mask RNG stream differs from torch by design).
    out_tr = jax.block_until_ready(
        positional_encoding(
            x, d_model=d_model, dropout_p=dropout_p, training=True, seed=123
        )
    )
    assert out_tr.shape == (batch, seq_len, d_model)
    assert bool(jnp.all(jnp.isfinite(out_tr)))
    kept = out_tr != 0
    assert jnp.allclose(
        jnp.where(kept, out_tr, 0.0),
        jnp.where(kept, ref / (1.0 - dropout_p), 0.0),
        atol=1e-5, rtol=1e-5,
    ), "kept values must equal (x + pe) / (1 - p)"

    # Exercise the streaming path (multi-step grid, batch-periodic PE index_map)
    # by forcing a tiny per-buffer budget on a slightly larger shape.
    x2 = jax.random.normal(jax.random.PRNGKey(1), (2, 32, 64), dtype=jnp.float32)
    ref2 = x2 + _make_pe_table(32, 64)[None]
    out2 = jax.block_until_ready(
        positional_encoding(x2, d_model=64, dropout_p=0.0, training=False,
                            target_bytes=4096)
    )
    assert jnp.allclose(out2, ref2, atol=1e-5, rtol=1e-5), "mismatch (streamed path)"

    print("KERNEL_OK")
</pallas_src>

<mosaic_0001>
module attributes {stable_mosaic.version = 11 : i64} {
  func.func @_pe_dropout_kernel(%arg0: i32, %arg1: memref<4x128xf32, #tpu.memory_space<vmem>>, %arg2: memref<4x128xf32, #tpu.memory_space<vmem>>, %arg3: memref<4x128xf32, #tpu.memory_space<vmem>>) attributes {dimension_semantics = [#tpu.dimension_semantics<parallel>], iteration_bounds = array<i64: 1>, scalar_prefetch = 0 : i64, scratch_operands = 0 : i64, tpu.core_type = #tpu.core_type<tc>, window_params = [{transform_indices = @transform_0, window_bounds = array<i64: 4, 128>}, {pipeline_mode = #tpu.pipeline_mode<synchronous>, transform_indices = @transform_1, window_bounds = array<i64: 4, 128>}, {transform_indices = @transform_2, window_bounds = array<i64: 4, 128>}]} {
    %c0 = arith.constant 0 : index
    %c0_0 = arith.constant 0 : index
    %0 = vector.load %arg1[%c0, %c0_0] : memref<4x128xf32, #tpu.memory_space<vmem>>, vector<4x128xf32>
    %c0_1 = arith.constant 0 : index
    %c0_2 = arith.constant 0 : index
    %1 = vector.load %arg2[%c0_1, %c0_2] : memref<4x128xf32, #tpu.memory_space<vmem>>, vector<4x128xf32>
    %2 = arith.addf %0, %1 : vector<4x128xf32>
    %c0_3 = arith.constant 0 : index
    %c0_4 = arith.constant 0 : index
    %3 = vector.load %arg3[%c0_3, %c0_4] : memref<4x128xf32, #tpu.memory_space<vmem>>, vector<4x128xf32>
    tpu.vector_store %arg3[%c0_3, %c0_4], %2 {strides = array<i32>} : memref<4x128xf32, #tpu.memory_space<vmem>>, vector<4x128xf32>,
    return
  }
  func.func @transform_0(%arg0: i32) -> (i32, i32) {
    %c0_i32 = arith.constant 0 : i32
    %c0_i32_0 = arith.constant 0 : i32
    return %arg0, %c0_i32 : i32, i32
  }
  func.func @transform_1(%arg0: i32) -> (i32, i32) {
    %c0_i32 = arith.constant 0 : i32
    %c0_i32_0 = arith.constant 0 : i32
    %c0_i32_1 = arith.constant 0 : i32
    return %c0_i32, %c0_i32_0 : i32, i32
  }
  func.func @transform_2(%arg0: i32) -> (i32, i32) {
    %c0_i32 = arith.constant 0 : i32
    %c0_i32_0 = arith.constant 0 : i32
    return %arg0, %c0_i32 : i32, i32
  }
}

</mosaic_0001>

<bundles_post_ra>
// kernel: tpu_custom_call.1
= control target key start
LH: loop header
LB: loop body
LE: loop exit
PB: predicated region body
PF: predicated region fallthrough
CT: control target
= control target key end

     0   :  { %7 = vsyncpa [#allocation3], 0  ;;  %s137_s0 = inlined_call_operand.hbm [shape: f32[4,128], index: 0, kind: input, shape index: {}, may-alias: {0,2}]   ;;  %s138_s1 = inlined_call_operand.vmem [shape: f32[4,128], index: 1, kind: input, shape index: {}]   ;;  %s139_s2 = inlined_call_operand.hbm [shape: f32[4,128], index: 2, kind: output, shape index: {}, may-alias: {0,2}]  }
   0x1   :  { %8 = vsyncpa [#allocation4], 0  ;;  %s93_s9 = smov [#allocation2]   ;;  %s45_s13 = scalar_lea.hbm %s137_s0, 64 }
   0x2   :  { %s15_s10 = sshll.u32 %s93_s9, 4  ;;  %p46_p0 = scmp.ne.s32.totalorder %s137_s0, %s45_s13  ;;  %s16_s10 = int_to_ptr.vmem [resolvable:$true] %s15_s10 }
   0x3   :  { %p49_p1 = scmp.lt.u32.totalorder %s45_s13, %s137_s0 }
   0x5   :  { %p51_p2 = pnand %p49_p1, %p46_p0 }
   0x7   :  { %54 = shalt.err (!%p51_p2)
}
   0x8   :  { %s55_s18 = scalar_lea.vmem %s16_s10, 64  ;;  %p60_p4 = scmp.lt.s32.totalorder %s16_s10, %s16_s10 }
   0x9   :  { %p56_p3 = scmp.ne.s32.totalorder %s16_s10, %s55_s18  ;;  %p61_p5 = scmp.lt.s32.totalorder %s55_s18, %s55_s18 }
   0xb   :  { %p62_p6 = por %p61_p5, %p60_p4 }
   0xd   :  { %p63_p7 = pnand %p62_p6, %p56_p3 }
   0xf   :  { %66 = shalt.err (!%p63_p7)
}
  0x10   :  { %18 = dma.hbm_to_vmem [thread:$0]  %s137_s0, 64, %s16_s10, [#allocation3]  }
  0x11   :  { %89 = dma.done.wait [#allocation3], 64  }
  0x12   :  { %90 = vsyncadd [#allocation3], 4294967232  ;;  %s94_s21 = smov [#allocation5]   ;;  %v24_v0 = vld [vmem:[#allocation2] sm:$0xf] }
  0x13   :  { %s34_s22 = sshll.u32 %s94_s21, 4  ;;  %v25_v1 = vld [vmem:[%s138_s1] sm:$0xf]  ;;  %s35_s22 = int_to_ptr.vmem [resolvable:$true] %s34_s22 }
  0x14   :  { %v26_v2 = vadd.f32 %v25_v1, %v24_v0  ;;  %s67_s25 = scalar_lea.vmem %s35_s22, 64  ;;  %p72_p9 = scmp.lt.s32.totalorder %s35_s22, %s35_s22 }
  0x15   :  { %p68_p8 = scmp.ne.s32.totalorder %s35_s22, %s67_s25  ;;  %p73_p10 = scmp.lt.s32.totalorder %s67_s25, %s67_s25 }
  0x16   :  { %27 = vst [vmem:[#allocation5] sm:$0xf] %v26_v2 }
  0x17   :  { %p74_p11 = por %p73_p10, %p72_p9 }
  0x19   :  { %p75_p12 = pnand %p74_p11, %p68_p8 }
  0x1b   :  { %78 = shalt.err (!%p75_p12)
}
  0x1c   :  { %s79_s27 = scalar_lea.hbm %s139_s2, 64 }
  0x1d   :  { %p80_p13 = scmp.ne.s32.totalorder %s139_s2, %s79_s27  ;;  %p83_p0 = scmp.lt.u32.totalorder %s79_s27, %s139_s2 }
  0x1f   :  { %p85_p1 = pnand %p83_p0, %p80_p13 }
  0x21   :  { %88 = shalt.err (!%p85_p1)
}
  0x22   :  { %37 = dma.vmem_to_hbm [thread:$0]  %s35_s22, 64, %s139_s2, [#allocation4]  }
  0x23   :  { %91 = dma.done.wait [#allocation4], 64  }
  0x24   :  { %92 = vsyncadd [#allocation4], 4294967232 }
  0x25   :  { %41 = vsyncpa [#allocation3], 1 }
  0x26   :  { %42 = vsyncpa [#allocation4], 1 }

</bundles_post_ra>
